<compile_context>
chip_gen: v7x
topology: tpu7x:2x2x1
jax: 0.10.0
libtpu: 0.0.40
codegen_flags: <defaults>
</compile_context>

<pallas_src>
import jax
import jax.numpy as jnp
from jax.experimental import pallas as pl
from jax.experimental.pallas import tpu as pltpu


# ----------------------------- kernels ---------------------------------------


def _matmul_bias_kernel_f32out(x_ref, w_ref, b_ref, o_ref):
    """Pure tiled matmul + bias, accumulating directly into the f32 output tile.

    x_ref : VMEM (tm, tk)  activation tile (MXU dtype)
    w_ref : VMEM (tk, tn)  pre-fake-quantized, pre-transposed weight tile
    b_ref : VMEM (1,  tn)  pre-fake-quantized bias tile (f32)
    o_ref : VMEM (tm, tn)  f32 output tile (doubles as the accumulator)
    """
    k = pl.program_id(2)

    @pl.when(k == 0)
    def _():
        o_ref[...] = jnp.zeros_like(o_ref)

    o_ref[...] += jnp.dot(x_ref[...], w_ref[...], preferred_element_type=jnp.float32)

    @pl.when(k == pl.num_programs(2) - 1)
    def _():
        o_ref[...] += b_ref[...]


def _matmul_bias_kernel_acc(x_ref, w_ref, b_ref, o_ref, acc_ref):
    """Same as above, but with an f32 scratch accumulator for non-f32 outputs."""
    k = pl.program_id(2)

    @pl.when(k == 0)
    def _():
        acc_ref[...] = jnp.zeros_like(acc_ref)

    acc_ref[...] += jnp.dot(x_ref[...], w_ref[...], preferred_element_type=jnp.float32)

    @pl.when(k == pl.num_programs(2) - 1)
    def _():
        o_ref[...] = (acc_ref[...] + b_ref[...]).astype(o_ref.dtype)


# ----------------------------- wrapper ----------------------------------------


def _pick_tile(dim, preferred, align):
    """Largest tile <= `preferred` that divides `dim` and is a multiple of
    `align`; falls back to the full dim (always a legal block shape)."""
    if dim <= preferred:
        return dim
    t = preferred
    while t >= align:
        if dim % t == 0:
            return t
        t //= 2
    return dim


def _fake_quant(t32, num_bits):
    """Per-tensor min/max fake quantization in f32 (one fused XLA pass)."""
    denom = jnp.float32(2 ** num_bits - 1)
    rng = jnp.max(t32) - jnp.min(t32)
    # Degenerate constant-tensor guard (reference would NaN); identical otherwise.
    scale = jnp.where(rng > 0, rng / denom, jnp.float32(1.0))
    return jnp.round(t32 / scale) * scale


def linear_quant(x, w, b, num_bits=8, *, tm=512, tn=512, tk=1024,
                 mxu_dtype=None, out_dtype=None):
    """Fake-quantized linear: y = x @ fq(w).T + fq(b).

    mxu_dtype: dtype fed to the MXU for both operands (default: x.dtype).
               Pass jnp.bfloat16 for the fast MXU path on v5e/v6e/v7x.
    """
    M, K = x.shape
    N, K2 = w.shape
    assert K == K2 and b.shape == (N,)

    mxu_dtype = x.dtype if mxu_dtype is None else mxu_dtype
    out_dtype = x.dtype if out_dtype is None else out_dtype

    # ---- fake-quant of weight & bias: once, in plain XLA (hoisted) ----------
    # Fused: round(w/ws)*ws  ->  transpose to (K, N)  ->  cast to MXU dtype.
    w_fq_t = jnp.transpose(_fake_quant(w.astype(jnp.float32), num_bits)).astype(mxu_dtype)
    b_fq = _fake_quant(b.astype(jnp.float32), num_bits).reshape(1, N)  # kept f32

    x_in = x.astype(mxu_dtype)

    # ---- tile selection -------------------------------------------------------
    in_itemsize = jnp.dtype(mxu_dtype).itemsize
    out_itemsize = jnp.dtype(out_dtype).itemsize
    sublane_align = max(8, 32 // in_itemsize)      # f32: 8, bf16: 16, int8: 32

    tm = _pick_tile(M, tm, sublane_align)
    tn = _pick_tile(N, tn, 128)
    tk = _pick_tile(K, tk, 128)

    grid_m, grid_n, grid_k = M // tm, N // tn, K // tk
    grid = (grid_m, grid_n, grid_k)

    use_acc = out_dtype != jnp.float32

    # ---- VMEM budget -> scoped limit (double-buffered tiles + accumulator) ----
    vmem_est = (
        2 * (tm * tk + tk * tn) * in_itemsize   # x / w double buffers
        + 2 * tm * tn * out_itemsize            # output double buffer
        + 2 * tn * 4                            # bias
        + (tm * tn * 4 if use_acc else 0)       # f32 accumulator scratch
    )
    vmem_limit = min(max(2 * vmem_est, 32 << 20), 64 << 20)

    # Advisory cost hint; bytes account for re-streaming (x read grid_n times,
    # weight read grid_m times).
    cost = pl.CostEstimate(
        flops=2 * M * N * K,
        transcendentals=0,
        bytes_accessed=(M * K * grid_n + K * N * grid_m) * in_itemsize
        + M * N * out_itemsize + 4 * N,
    )

    kernel = _matmul_bias_kernel_acc if use_acc else _matmul_bias_kernel_f32out
    scratch = [pltpu.VMEM((tm, tn), jnp.float32)] if use_acc else []

    return pl.pallas_call(
        kernel,
        out_shape=jax.ShapeDtypeStruct((M, N), out_dtype),
        grid_spec=pltpu.PrefetchScalarGridSpec(
            num_scalar_prefetch=0,
            grid=grid,
            in_specs=[
                pl.BlockSpec((tm, tk), lambda i, j, k: (i, k)),  # x tile
                pl.BlockSpec((tk, tn), lambda i, j, k: (k, j)),  # fq(w).T tile
                pl.BlockSpec((1, tn), lambda i, j, k: (0, j)),   # fq bias tile
            ],
            out_specs=pl.BlockSpec((tm, tn), lambda i, j, k: (i, j)),
            scratch_shapes=scratch,
        ),
        compiler_params=pltpu.CompilerParams(
            dimension_semantics=("parallel", "parallel", "arbitrary"),
            vmem_limit_bytes=int(vmem_limit),
        ),
        cost_estimate=cost,
    )(x_in, w_fq_t, b_fq)


# ----------------------------- reference & test --------------------------------


def _reference(x, w, b, num_bits=8):
    denom = jnp.float32(2 ** num_bits - 1)
    ws = (jnp.max(w) - jnp.min(w)) / denom
    wq = jnp.round(w / ws) * ws
    bs = (jnp.max(b) - jnp.min(b)) / denom
    bq = jnp.round(b / bs) * bs
    return x @ wq.T + bq


if __name__ == "__main__":
    # Small shapes consistent with the module: batch=8, in_features=32, out_features=16
    batch, in_features, out_features = 8, 32, 16
    num_bits = 8

    key = jax.random.PRNGKey(0)
    kx, kw, kb = jax.random.split(key, 3)

    x = jax.random.normal(kx, (batch, in_features), dtype=jnp.float32)

    # Deterministic nn.Linear-style init: U(-1/sqrt(in), 1/sqrt(in))
    bound = 1.0 / (in_features ** 0.5)
    w = jax.random.uniform(kw, (out_features, in_features), dtype=jnp.float32,
                           minval=-bound, maxval=bound)
    b = jax.random.uniform(kb, (out_features,), dtype=jnp.float32,
                           minval=-bound, maxval=bound)

    y = linear_quant(x, w, b, num_bits=num_bits)
    y = jax.block_until_ready(y)

    y_ref = _reference(x, w, b, num_bits=num_bits)
    assert y.shape == (batch, out_features)
    assert jnp.allclose(y, y_ref, atol=1e-5, rtol=1e-5), "mismatch vs reference"

    print("KERNEL_OK")
</pallas_src>

<mosaic_0001>
module attributes {stable_mosaic.version = 11 : i64} {
  func.func @_matmul_bias_kernel_f32out(%arg0: i32, %arg1: i32, %arg2: i32, %arg3: memref<8x32xf32, #tpu.memory_space<vmem>>, %arg4: memref<32x16xf32, #tpu.memory_space<vmem>>, %arg5: memref<1x16xf32, #tpu.memory_space<vmem>>, %arg6: memref<8x16xf32, #tpu.memory_space<vmem>>) attributes {dimension_semantics = [#tpu.dimension_semantics<parallel>, #tpu.dimension_semantics<parallel>, #tpu.dimension_semantics<arbitrary>], iteration_bounds = array<i64: 1, 1, 1>, scalar_prefetch = 0 : i64, scratch_operands = 0 : i64, tpu.core_type = #tpu.core_type<tc>, window_params = [{transform_indices = @transform_0, window_bounds = array<i64: 8, 32>}, {transform_indices = @transform_1, window_bounds = array<i64: 32, 16>}, {transform_indices = @transform_2, window_bounds = array<i64: 1, 16>}, {transform_indices = @transform_3, window_bounds = array<i64: 8, 16>}]} {
    %c0_i32 = arith.constant 0 : i32
    %0 = arith.cmpi eq, %arg2, %c0_i32 : i32
    %1 = arith.extui %0 : i1 to i32
    %c0_i32_0 = arith.constant 0 : i32
    %2 = arith.cmpi ne, %1, %c0_i32_0 : i32
    scf.if %2 {
      %cst_10 = arith.constant 0.000000e+00 : f32
      %12 = vector.broadcast %cst_10 : f32 to vector<8x16xf32>
      %c0_11 = arith.constant 0 : index
      %c0_12 = arith.constant 0 : index
      %13 = vector.load %arg6[%c0_11, %c0_12] : memref<8x16xf32, #tpu.memory_space<vmem>>, vector<8x16xf32>
      tpu.vector_store %arg6[%c0_11, %c0_12], %12 {strides = array<i32>} : memref<8x16xf32, #tpu.memory_space<vmem>>, vector<8x16xf32>,
    } else {
    }
    %c0 = arith.constant 0 : index
    %c0_1 = arith.constant 0 : index
    %3 = vector.load %arg6[%c0, %c0_1] : memref<8x16xf32, #tpu.memory_space<vmem>>, vector<8x16xf32>
    %c0_2 = arith.constant 0 : index
    %c0_3 = arith.constant 0 : index
    %4 = vector.load %arg3[%c0_2, %c0_3] : memref<8x32xf32, #tpu.memory_space<vmem>>, vector<8x32xf32>
    %c0_4 = arith.constant 0 : index
    %c0_5 = arith.constant 0 : index
    %5 = vector.load %arg4[%c0_4, %c0_5] : memref<32x16xf32, #tpu.memory_space<vmem>>, vector<32x16xf32>
    %cst = arith.constant dense<0.000000e+00> : vector<8x16xf32>
    %6 = tpu.matmul %4, %5, %cst {dimension_numbers = #tpu.dot_dimension_numbers<[1], [0], [0], [1], [0, 0, 1, 1], [], []>} : vector<8x32xf32>, vector<32x16xf32>, vector<8x16xf32> -> vector<8x16xf32>
    %7 = arith.addf %3, %6 : vector<8x16xf32>
    %c0_6 = arith.constant 0 : index
    %c0_7 = arith.constant 0 : index
    %8 = vector.load %arg6[%c0_6, %c0_7] : memref<8x16xf32, #tpu.memory_space<vmem>>, vector<8x16xf32>
    tpu.vector_store %arg6[%c0_6, %c0_7], %7 {strides = array<i32>} : memref<8x16xf32, #tpu.memory_space<vmem>>, vector<8x16xf32>,
    %c0_i32_8 = arith.constant 0 : i32
    %9 = arith.cmpi eq, %arg2, %c0_i32_8 : i32
    %10 = arith.extui %9 : i1 to i32
    %c0_i32_9 = arith.constant 0 : i32
    %11 = arith.cmpi ne, %10, %c0_i32_9 : i32
    scf.if %11 {
      %c0_10 = arith.constant 0 : index
      %c0_11 = arith.constant 0 : index
      %12 = vector.load %arg6[%c0_10, %c0_11] : memref<8x16xf32, #tpu.memory_space<vmem>>, vector<8x16xf32>
      %c0_12 = arith.constant 0 : index
      %c0_13 = arith.constant 0 : index
      %13 = vector.load %arg5[%c0_12, %c0_13] : memref<1x16xf32, #tpu.memory_space<vmem>>, vector<1x16xf32>
      %14 = vector.broadcast %13 : vector<1x16xf32> to vector<8x16xf32>
      %15 = arith.addf %12, %14 : vector<8x16xf32>
      %c0_14 = arith.constant 0 : index
      %c0_15 = arith.constant 0 : index
      %16 = vector.load %arg6[%c0_14, %c0_15] : memref<8x16xf32, #tpu.memory_space<vmem>>, vector<8x16xf32>
      tpu.vector_store %arg6[%c0_14, %c0_15], %15 {strides = array<i32>} : memref<8x16xf32, #tpu.memory_space<vmem>>, vector<8x16xf32>,
    } else {
    }
    return
  }
  func.func @transform_0(%arg0: i32, %arg1: i32, %arg2: i32) -> (i32, i32) {
    %c0_i32 = arith.constant 0 : i32
    return %arg0, %arg2 : i32, i32
  }
  func.func @transform_1(%arg0: i32, %arg1: i32, %arg2: i32) -> (i32, i32) {
    %c0_i32 = arith.constant 0 : i32
    return %arg2, %arg1 : i32, i32
  }
  func.func @transform_2(%arg0: i32, %arg1: i32, %arg2: i32) -> (i32, i32) {
    %c0_i32 = arith.constant 0 : i32
    %c0_i32_0 = arith.constant 0 : i32
    return %c0_i32, %arg1 : i32, i32
  }
  func.func @transform_3(%arg0: i32, %arg1: i32, %arg2: i32) -> (i32, i32) {
    %c0_i32 = arith.constant 0 : i32
    return %arg0, %arg1 : i32, i32
  }
}

</mosaic_0001>

<bundles_post_ra>
// kernel: tpu_custom_call.1
= control target key start
LH: loop header
LB: loop body
LE: loop exit
PB: predicated region body
PF: predicated region fallthrough
CT: control target
= control target key end

     0   :  { %vm19_vm0 = vcmask 130048   ;;  %v183_v3 = vmov 0.0|0.0   ;;  %v184_v6 = vmov 0.0   ;;  %s240_s0 = inlined_call_operand.vmem [shape: f32[8,32], index: 0, kind: input, shape index: {}]   ;;  %s241_s1 = inlined_call_operand.vmem [shape: f32[32,16], index: 1, kind: input, shape index: {}]   ;;  %s242_s2 = inlined_call_operand.vmem [shape: f32[1,16], index: 2, kind: input, shape index: {}]   ;;  %s243_s3 = inlined_call_operand.hbm [shape: f32[8,16], index: 3, kind: output, shape index: {}]  }
   0x1   :  { %v23_v0 = vld [vmem:[%s241_s1] sm:$0xff]  ;;  %v24_v1 = vld [vmem:[%s241_s1 + $0x8] sm:$0xff]  ;;  %v25_v2 = vld [vmem:[%s241_s1 + $0x10] sm:$0xff]  ;;  %149 = vmatprep.subr.bf16.mxu0 %v183_v3  ;;  %20 = vst.msk [vmem:[#allocation2] sm:$0xff] %vm19_vm0, %v184_v6 }
   0x2   :  { %v150_v4 = vpack.c.bf16 %v24_v1, %v23_v0  ;;  %v26_v5 = vld [vmem:[%s241_s1 + $0x18] sm:$0xff] }
   0x3   :  { %8 = vsyncpa [#allocation3], 0  ;;  %vm185_vm1 = vmmov 0   ;;  %v153_v7 = vpack.c.bf16 %v26_v5, %v25_v2  ;;  %v22_v8 = vld [vmem:[%s240_s0] sm:$0xff]  ;;  %vm27_vm2 = vcmask 261120   ;;  %s186_s23 = smov [#allocation2]  }
   0x4   :  { %146 = vmatprep.mubr.msk.f32.mxu0 %vm185_vm1, %v184_v6  ;;  %151 = vmatpush3.bf16.msra.mxu0 %v150_v4  ;;  %v132_v13 = vld [vmem:[%s242_s2] ss:$0 sm:$0xff]  ;;  %s123_s24 = sshll.u32 %s186_s23, 4  ;;  %s124_s24 = int_to_ptr.vmem [resolvable:$true] %s123_s24 }
   0x5   :  { %152 = vmatprep.subr.bf16.mxu0 %v183_v3  ;;  %s159_s0 = scalar_lea.vmem %s124_s24, 128  ;;  %p164_p1 = scmp.lt.s32.totalorder %s124_s24, %s124_s24 }
   0x6   :  { %p160_p0 = scmp.ne.s32.totalorder %s124_s24, %s159_s0  ;;  %p165_p2 = scmp.lt.s32.totalorder %s159_s0, %s159_s0 }
   0x8   :  { %154 = vmatpush3.bf16.msra.mxu0 %v153_v7  ;;  %v21_v9 = vld [vmem:[#allocation2] sm:$0xff]  ;;  %p166_p3 = por %p165_p2, %p164_p1 }
   0xa   :  { %p167_p4 = pnand %p166_p3, %p160_p0 }
   0xb   :  { %147 = vmatmul.mubr.msk.f32.vlgmr.msra.gmra.mrb[0].mxu0 %vm27_vm2, %v22_v8 }
  0xde   :  { %v97_v10 = vpop.f32.mrb[0].mxu0 }
  0xdf   :  { %v101_v11 = vadd.f32 %v97_v10, %v21_v9  ;;  %v148_v12 = vpop.f32.mrb[1].mxu0 }
  0xe1   :  { %103 = vst.msk [vmem:[#allocation2] sm:$0xff] %vm19_vm0, %v101_v11 }
  0xe8   :  { %v107_v14 = vld [vmem:[#allocation2] sm:$0xff] }
  0xe9   :  { %v115_v15 = vadd.f32 %v132_v13, %v107_v14 }
  0xeb   :  { %116 = vst.msk [vmem:[#allocation2] sm:$0xff] %vm19_vm0, %v115_v15 }
  0xec   :  { %170 = shalt.err (!%p167_p4)
}
  0xed   :  { %s171_s27 = scalar_lea.hbm %s243_s3, 128 }
  0xee   :  { %p172_p5 = scmp.ne.s32.totalorder %s243_s3, %s171_s27  ;;  %p175_p6 = scmp.lt.u32.totalorder %s171_s27, %s243_s3 }
  0xf0   :  { %p177_p7 = pnand %p175_p6, %p172_p5 }
  0xf2   :  { %180 = shalt.err (!%p177_p7)
}
  0xf3   :  { %126 = dma.vmem_to_hbm [thread:$0]  %s124_s24, 128, %s243_s3, [#allocation3]  }
  0xf4   :  { %181 = dma.done.wait [#allocation3], 128  }
  0xf5   :  { %182 = vsyncadd [#allocation3], 4294967168 }
  0xf6   :  { %130 = vsyncpa [#allocation3], 1 }

</bundles_post_ra>
